<compile_context>
chip_gen: v5e
topology: v5e:2x2
jax: 0.10.0
libtpu: 0.0.40
codegen_flags: <defaults>
</compile_context>

<pallas_src>
import functools

import jax
import jax.numpy as jnp
from jax import lax
from jax.experimental import pallas as pl
from jax.experimental.pallas import tpu as pltpu


# ----------------------------------------------------------------------------
# Kernels
# ----------------------------------------------------------------------------
def _cam_slab_kernel(c_valid, mm_dtype, gamma_ref, x_ref, out_ref):
    # gamma_ref: (1,) f32 in SMEM
    # x_ref:     (Cp, Np) full per-batch slab (VMEM-resident across the ci axis)
    # out_ref:   (tC, Np) output rows for this channel tile
    tC = out_ref.shape[0]
    Cp = x_ref.shape[0]
    ci = pl.program_id(1)
    row0 = pl.multiple_of(ci * tC, tC)

    x_full = x_ref[...]                         # (Cp, Np) input dtype
    x_rows = x_ref[pl.ds(row0, tC), :]          # (tC, Np)
    a = x_rows.astype(mm_dtype)                 # no-op when mm_dtype == input dtype
    bm = x_full.astype(mm_dtype)

    # energy = x_rows @ x_full^T : contract the lane (N) axis of BOTH operands
    # (same contraction form as flash attention's q @ k^T), so no slab
    # transpose is materialized.
    # TODO(synk): verify in the bundle dump that no per-ci vxpose of the slab is
    # emitted; if it is, hoist a once-per-batch transpose under pl.when(ci==0).
    energy = lax.dot_general(
        a, bm,
        dimension_numbers=(((1,), (1,)), ((), ())),
        preferred_element_type=jnp.float32)     # (tC, Cp)

    if c_valid != Cp:
        # Masked channel padding: +inf removes padded columns from the row-min
        # and makes exp(min - inf) == 0, dropping them from the softmax sum.
        col = lax.broadcasted_iota(jnp.int32, energy.shape, 1)
        energy = jnp.where(col < c_valid, energy, jnp.inf)

    # softmax(rowmax(E) - E) == exp(rowmin(E) - E) / sum   (exponent <= 0).
    p = jnp.exp(jnp.min(energy, axis=-1, keepdims=True) - energy)
    attn = p / jnp.sum(p, axis=-1, keepdims=True)          # exact divide

    # out = attn @ x_full (bf16 MXU path for bf16 operands), f32 accumulation.
    out = jnp.dot(attn.astype(mm_dtype), bm,
                  preferred_element_type=jnp.float32)       # (tC, Np)

    out_ref[...] = (gamma_ref[0] * out
                    + x_rows.astype(jnp.float32)).astype(out_ref.dtype)


def _cam_attn_kernel(c_valid, mm_dtype, x_ref, attn_ref, e_acc):
    # Pass 1 of the two-pass fallback: accumulate E over N tiles, finalize softmax.
    # x_ref:    (Cp, tN) N-tile of the per-batch slab
    # attn_ref: (Cp, Cp) attention output (same block across the N axis)
    # e_acc:    (Cp, Cp) f32 energy accumulator scratch
    n = pl.program_id(1)

    @pl.when(n == 0)
    def _init():
        e_acc[...] = jnp.zeros_like(e_acc)

    xt = x_ref[...].astype(mm_dtype)
    e_acc[...] += lax.dot_general(
        xt, xt,
        dimension_numbers=(((1,), (1,)), ((), ())),
        preferred_element_type=jnp.float32)

    @pl.when(n == pl.num_programs(1) - 1)
    def _finalize():
        energy = e_acc[...]
        Cp = energy.shape[0]
        if c_valid != Cp:
            col = lax.broadcasted_iota(jnp.int32, energy.shape, 1)
            energy = jnp.where(col < c_valid, energy, jnp.inf)
        p = jnp.exp(jnp.min(energy, axis=-1, keepdims=True) - energy)
        attn = p / jnp.sum(p, axis=-1, keepdims=True)
        attn_ref[...] = attn.astype(attn_ref.dtype)


def _cam_apply_kernel(mm_dtype, gamma_ref, attn_ref, x_ref, out_ref):
    # Pass 2 of the two-pass fallback: out = gamma * (attn @ x) + x, N-tiled.
    x_tile = x_ref[...]                                     # (Cp, tN)
    out = jnp.dot(attn_ref[...], x_tile.astype(mm_dtype),
                  preferred_element_type=jnp.float32)
    out_ref[...] = (gamma_ref[0] * out
                    + x_tile.astype(jnp.float32)).astype(out_ref.dtype)


# ----------------------------------------------------------------------------
# Planning helpers
# ----------------------------------------------------------------------------
def _round_up(x, m):
    return (x + m - 1) // m * m


def _vmem_budget_bytes():
    """Generation-aware VMEM budget (~0.85x physical per-TensorCore capacity)."""
    try:
        cap = int(pltpu.get_tpu_info().vmem_capacity_bytes)
    except Exception:
        cap = 64 * 1024 * 1024          # conservative fallback (v7x per-TC)
    cap = max(cap, 32 * 1024 * 1024)
    return int(cap * 0.85)


def _plan_slab_path(Cp, Np, itemsize, budget):
    """Pick (tC, slab_buffer_count) for the slab-resident path, or None."""
    tiles = [t for t in (256, 128) if Cp % t == 0] or [Cp]
    for tC in tiles:                    # prefer the native 256 MXU streaming dim
        for slab_bufs in (2, 1):        # then single-buffer the slab (v7x relief)
            est = (slab_bufs * Cp * Np * itemsize   # resident (Cp, Np) input slab
                   + 2 * tC * Np * itemsize         # double-buffered output tile
                   + 3 * tC * Cp * 4                # energy / p / attn f32 temps
                   + 2 * tC * Np * 4)               # out + x_rows f32 temps
            if est <= budget:
                return tC, slab_bufs
    return None


def _pick_n_tile(Np, per_col_bytes, fixed_bytes, budget):
    for t in (4096, 2048, 1024, 512, 256, 128):
        if Np % t == 0 and fixed_bytes + per_col_bytes * t <= budget:
            return t
    return 128


# ----------------------------------------------------------------------------
# Wrapper
# ----------------------------------------------------------------------------
def cam_module(x, gamma, *, matmul_dtype=None, force_two_pass=False):
    """x: (B, C, H, W), gamma: (1,) -> out: (B, C, H, W)."""
    B, C, H, W = x.shape
    N = H * W
    dtype = x.dtype
    itemsize = jnp.dtype(dtype).itemsize
    mm_dtype = jnp.dtype(matmul_dtype) if matmul_dtype is not None else jnp.dtype(dtype)

    # Lane / channel padding (see header comment).
    Np = _round_up(N, 128)
    Cp = C if C <= 128 else _round_up(C, 128)

    x3 = x.reshape(B, C, N)
    if Np != N or Cp != C:
        x3 = jnp.pad(x3, ((0, 0), (0, Cp - C), (0, Np - N)))

    gamma = jnp.asarray(gamma, jnp.float32).reshape((1,))
    budget = _vmem_budget_bytes()
    plan = None if force_two_pass else _plan_slab_path(Cp, Np, itemsize, budget)

    if plan is not None:
        # ------------------------- slab-resident path -------------------------
        tC, slab_bufs = plan
        nC = Cp // tC
        slab_kwargs = {}
        if slab_bufs == 1:
            # v7x VMEM relief: the slab's block index is constant in ci, so the
            # second buffer would only prefetch the NEXT batch's slab.  Dropping
            # it saves Cp*Np*itemsize for one exposed DMA per batch, amortized
            # over nC compute steps.  (On v5e/v6e there is headroom to keep the
            # default double buffer; deepen to pl.Buffered(3) only if xprof
            # shows the per-batch slab DMA exposed.)
            slab_kwargs["pipeline_mode"] = pl.Buffered(1)

        out3 = pl.pallas_call(
            functools.partial(_cam_slab_kernel, C, mm_dtype),
            out_shape=jax.ShapeDtypeStruct((B, Cp, Np), dtype),
            grid=(B, nC),
            in_specs=[
                pl.BlockSpec(memory_space=pltpu.MemorySpace.SMEM),           # gamma
                pl.BlockSpec((pl.Squeezed(), Cp, Np), lambda b, ci: (b, 0, 0),
                             **slab_kwargs),                                 # slab
            ],
            out_specs=pl.BlockSpec((pl.Squeezed(), tC, Np),
                                   lambda b, ci: (b, ci, 0)),
            compiler_params=pltpu.CompilerParams(
                # Bias megacore sharding to the batch axis when B >= 2 so each
                # v7x core fetches the slab once per batch it owns.
                dimension_semantics=(("parallel", "arbitrary") if B >= 2
                                     else ("parallel", "parallel")),
                vmem_limit_bytes=budget,
            ),
            cost_estimate=pl.CostEstimate(
                flops=int(4 * B * Cp * Cp * Np),
                transcendentals=int(B * Cp * Cp),
                bytes_accessed=int(2 * B * Cp * Np * itemsize),
            ),
        )(gamma, x3)
    else:
        # ---------------------- two-pass N-tiled fallback ---------------------
        # Pass 1: attention = softmax(rowmax(E) - E) with an N-reduction axis.
        fixed1 = (Cp * Cp * 4                      # e_acc scratch
                  + 2 * Cp * Cp * mm_dtype.itemsize  # attn output buffers
                  + 2 * Cp * Cp * 4)               # p / attn f32 temps
        tN = _pick_n_tile(Np, 2 * Cp * itemsize, fixed1, budget)
        attn = pl.pallas_call(
            functools.partial(_cam_attn_kernel, C, mm_dtype),
            out_shape=jax.ShapeDtypeStruct((B, Cp, Cp), mm_dtype),
            grid=(B, Np // tN),
            in_specs=[pl.BlockSpec((pl.Squeezed(), Cp, tN),
                                   lambda b, n: (b, 0, n))],
            out_specs=pl.BlockSpec((pl.Squeezed(), Cp, Cp),
                                   lambda b, n: (b, 0, 0)),
            scratch_shapes=[pltpu.VMEM((Cp, Cp), jnp.float32)],
            compiler_params=pltpu.CompilerParams(
                dimension_semantics=("parallel", "arbitrary"),
                vmem_limit_bytes=budget,
            ),
            cost_estimate=pl.CostEstimate(
                flops=int(2 * B * Cp * Cp * Np),
                transcendentals=int(B * Cp * Cp),
                bytes_accessed=int(B * Cp * Np * itemsize
                                   + B * Cp * Cp * mm_dtype.itemsize),
            ),
        )(x3)

        # Pass 2: out = gamma * (attn @ x) + x, streaming N tiles again.
        fixed2 = 2 * Cp * Cp * mm_dtype.itemsize       # resident attn buffers
        per_col2 = 4 * Cp * itemsize + 2 * Cp * 4      # x + out tiles + f32 temps
        tN2 = _pick_n_tile(Np, per_col2, fixed2, budget)
        out3 = pl.pallas_call(
            functools.partial(_cam_apply_kernel, mm_dtype),
            out_shape=jax.ShapeDtypeStruct((B, Cp, Np), dtype),
            grid=(B, Np // tN2),
            in_specs=[
                pl.BlockSpec(memory_space=pltpu.MemorySpace.SMEM),             # gamma
                pl.BlockSpec((pl.Squeezed(), Cp, Cp), lambda b, n: (b, 0, 0)),  # attn
                pl.BlockSpec((pl.Squeezed(), Cp, tN2), lambda b, n: (b, 0, n)),
            ],
            out_specs=pl.BlockSpec((pl.Squeezed(), Cp, tN2),
                                   lambda b, n: (b, 0, n)),
            compiler_params=pltpu.CompilerParams(
                dimension_semantics=("parallel", "parallel"),
                vmem_limit_bytes=budget,
            ),
            cost_estimate=pl.CostEstimate(
                flops=int(2 * B * Cp * Cp * Np),
                transcendentals=0,
                bytes_accessed=int(2 * B * Cp * Np * itemsize
                                   + B * Cp * Cp * mm_dtype.itemsize),
            ),
        )(gamma, attn, x3)

    if Cp != C or Np != N:
        out3 = out3[:, :C, :N]
    return out3.reshape(B, C, H, W)


# ----------------------------------------------------------------------------
# Pure-JAX reference (mirrors the PyTorch forward, high-precision einsums)
# ----------------------------------------------------------------------------
def cam_reference(x, gamma):
    B, C, H, W = x.shape
    proj = x.reshape(B, C, -1).astype(jnp.float32)
    energy = jnp.einsum('bcn,bdn->bcd', proj, proj,
                        precision=jax.lax.Precision.HIGHEST)
    energy_new = jnp.max(energy, axis=-1, keepdims=True) - energy
    attention = jax.nn.softmax(energy_new, axis=-1)
    out = jnp.einsum('bcd,bdn->bcn', attention, proj,
                     precision=jax.lax.Precision.HIGHEST).reshape(B, C, H, W)
    g = jnp.asarray(gamma, jnp.float32).reshape(())
    return (g * out + x.astype(jnp.float32)).astype(x.dtype)


if __name__ == "__main__":
    k1, k2, k3 = jax.random.split(jax.random.PRNGKey(0), 3)

    # Tolerance note: gamma != 0 tests are bounded by f32-matmul rounding
    # amplified through exp() at O(100)-magnitude energies (the approx EUP
    # reciprocal of the previous version was removed, so this is much tighter
    # than the old 1e-2 band).
    TOL = 1e-3

    # 1) Small shape (tC == C fallback, N already a lane multiple).
    x1 = jax.random.normal(k1, (2, 4, 16, 16), dtype=jnp.float32)
    gamma0 = jnp.zeros((1,), dtype=jnp.float32)            # PyTorch init: gamma = 0
    out = jax.block_until_ready(cam_module(x1, gamma0))
    assert jnp.allclose(out, cam_reference(x1, gamma0), atol=1e-5, rtol=1e-5)

    gamma1 = jnp.array([0.5], dtype=jnp.float32)
    out = jax.block_until_ready(cam_module(x1, gamma1))
    assert jnp.allclose(out, cam_reference(x1, gamma1), atol=TOL, rtol=TOL)

    # 2) Channel-tiled slab path (C=512 -> multiple channel tiles, pl.ds row
    #    slicing, N=121 padded to 128).
    x2 = jax.random.normal(k2, (2, 512, 11, 11), dtype=jnp.float32)
    out = jax.block_until_ready(cam_module(x2, gamma1))
    assert jnp.allclose(out, cam_reference(x2, gamma1), atol=TOL, rtol=TOL)

    # 3) Masked channel padding (C=200 -> Cp=256, N=289 -> Np=384) on both the
    #    slab path and the forced two-pass N-tiled fallback.
    x3 = jax.random.normal(k3, (1, 200, 17, 17), dtype=jnp.float32)
    gamma2 = jnp.array([0.3], dtype=jnp.float32)
    ref3 = cam_reference(x3, gamma2)
    out_slab = jax.block_until_ready(cam_module(x3, gamma2))
    assert jnp.allclose(out_slab, ref3, atol=TOL, rtol=TOL)
    out_2p = jax.block_until_ready(cam_module(x3, gamma2, force_two_pass=True))
    assert jnp.allclose(out_2p, ref3, atol=TOL, rtol=TOL)

    print("KERNEL_OK")
</pallas_src>

<mosaic_0001>
module attributes {stable_mosaic.version = 11 : i64} {
  func.func @_cam_slab_kernel(%arg0: i32, %arg1: i32, %arg2: memref<1xf32, #tpu.memory_space<smem>>, %arg3: memref<1x4x256xf32, #tpu.memory_space<vmem>>, %arg4: memref<1x4x256xf32, #tpu.memory_space<vmem>>) attributes {dimension_semantics = [#tpu.dimension_semantics<parallel>, #tpu.dimension_semantics<arbitrary>], iteration_bounds = array<i64: 2, 1>, scalar_prefetch = 0 : i64, scratch_operands = 0 : i64, tpu.core_type = #tpu.core_type<tc>, window_params = [{transform_indices = @transform_0, window_bounds = array<i64: 1>}, {transform_indices = @transform_1, window_bounds = array<i64: 1, 4, 256>}, {transform_indices = @transform_2, window_bounds = array<i64: 1, 4, 256>}]} {
    %c4_i32 = arith.constant 4 : i32
    %0 = arith.muli %arg1, %c4_i32 : i32
    %1 = tpu.assume_multiple %0, 4 : i32
    %c0 = arith.constant 0 : index
    %c0_0 = arith.constant 0 : index
    %c0_1 = arith.constant 0 : index
    %2 = vector.load %arg3[%c0, %c0_0, %c0_1] : memref<1x4x256xf32, #tpu.memory_space<vmem>>, vector<1x4x256xf32>
    %3 = vector.shape_cast %2 : vector<1x4x256xf32> to vector<4x256xf32>
    %c0_2 = arith.constant 0 : index
    %4 = arith.index_cast %1 : i32 to index
    %c0_3 = arith.constant 0 : index
    %5 = vector.load %arg3[%c0_2, %4, %c0_3] : memref<1x4x256xf32, #tpu.memory_space<vmem>>, vector<1x4x256xf32>
    %6 = vector.shape_cast %5 : vector<1x4x256xf32> to vector<4x256xf32>
    %cst = arith.constant dense<0.000000e+00> : vector<4x4xf32>
    %7 = tpu.matmul %6, %3, %cst {dimension_numbers = #tpu.dot_dimension_numbers<[1], [1], [0], [0], [0, 0, 1, 0], [], []>} : vector<4x256xf32>, vector<4x256xf32>, vector<4x4xf32> -> vector<4x4xf32>
    %cst_4 = arith.constant dense<0x7F800000> : vector<4xf32>
    %8 = vector.multi_reduction <minimumf>, %7, %cst_4 [1] : vector<4x4xf32> to vector<4xf32>
    %9 = vector.shape_cast %8 : vector<4xf32> to vector<4x1xf32>
    %10 = vector.broadcast %9 : vector<4x1xf32> to vector<4x4xf32>
    %11 = arith.subf %10, %7 : vector<4x4xf32>
    %12 = math.exp %11 : vector<4x4xf32>
    %cst_5 = arith.constant dense<0.000000e+00> : vector<4xf32>
    %13 = vector.multi_reduction <add>, %12, %cst_5 [1] : vector<4x4xf32> to vector<4xf32>
    %14 = vector.shape_cast %13 : vector<4xf32> to vector<4x1xf32>
    %15 = vector.broadcast %14 : vector<4x1xf32> to vector<4x4xf32>
    %16 = arith.divf %12, %15 : vector<4x4xf32>
    %cst_6 = arith.constant dense<0.000000e+00> : vector<4x256xf32>
    %17 = tpu.matmul %16, %3, %cst_6 {dimension_numbers = #tpu.dot_dimension_numbers<[1], [0], [0], [1], [0, 0, 1, 1], [], []>} : vector<4x4xf32>, vector<4x256xf32>, vector<4x256xf32> -> vector<4x256xf32>
    %c0_7 = arith.constant 0 : index
    %18 = memref.load %arg2[%c0_7] : memref<1xf32, #tpu.memory_space<smem>>
    %19 = vector.broadcast %18 : f32 to vector<4x256xf32>
    %20 = arith.mulf %19, %17 : vector<4x256xf32>
    %21 = arith.addf %20, %6 : vector<4x256xf32>
    %c0_8 = arith.constant 0 : index
    %c0_9 = arith.constant 0 : index
    %c0_10 = arith.constant 0 : index
    %22 = vector.load %arg4[%c0_8, %c0_9, %c0_10] : memref<1x4x256xf32, #tpu.memory_space<vmem>>, vector<1x4x256xf32>
    %23 = vector.shape_cast %22 : vector<1x4x256xf32> to vector<4x256xf32>
    %24 = vector.shape_cast %21 : vector<4x256xf32> to vector<1x4x256xf32>
    tpu.vector_store %arg4[%c0_8, %c0_9, %c0_10], %24 {strides = array<i32>} : memref<1x4x256xf32, #tpu.memory_space<vmem>>, vector<1x4x256xf32>,
    return
  }
  func.func @transform_0(%arg0: i32, %arg1: i32) -> i32 {
    %c0_i32 = arith.constant 0 : i32
    %c0_i32_0 = arith.constant 0 : i32
    return %c0_i32 : i32
  }
  func.func @transform_1(%arg0: i32, %arg1: i32) -> (i32, i32, i32) {
    %c0_i32 = arith.constant 0 : i32
    %c0_i32_0 = arith.constant 0 : i32
    %c0_i32_1 = arith.constant 0 : i32
    return %arg0, %c0_i32, %c0_i32_0 : i32, i32, i32
  }
  func.func @transform_2(%arg0: i32, %arg1: i32) -> (i32, i32, i32) {
    %c0_i32 = arith.constant 0 : i32
    %c0_i32_0 = arith.constant 0 : i32
    return %arg0, %arg1, %c0_i32 : i32, i32, i32
  }
}

</mosaic_0001>

<bundles_post_ra>
// kernel: tpu_custom_call.1
= control target key start
LH: loop header
LB: loop body
LE: loop exit
PB: predicated region body
PF: predicated region fallthrough
CT: control target
= control target key end

     0   :  { %s779_s0 = inlined_call_operand.<no memory space> [shape: f32[1], index: 0, kind: input, shape index: {}]   ;;  %s780_s1 = inlined_call_operand.hbm [shape: f32[2,4,256], index: 1, kind: input, shape index: {}]   ;;  %s781_s2 = inlined_call_operand.hbm [shape: f32[2,4,256], index: 2, kind: output, shape index: {}]  }
   0x1   :  { %7 = sst [smem:[#allocation2]] %s779_s0 }
   0x2   :  { %8 = vsyncpa [#allocation4], 0 }
   0x3   :  { %10 = vsyncpa [#allocation4 + $0x1], 0 }
   0x4   :  { %11 = vsyncpa [#allocation5], 0 }
   0x5   :  { %13 = vsyncpa [#allocation5 + $0x1], 0  ;;  %s652_s11 = smov 0   ;;  %s654_s12 = smov 0  }
   0x6   :  { %s656_s13 = smov 0   ;;  %s658_s14 = smov 0  }
   0x7   :  { %s660_s15 = smov 0   ;;  %s662_s16 = smov 0  }
   0x8 LB: > { %s433_s0 = sadd.s32 4294967295, %s632_s16   ;;  %s434_s17 = sadd.s32 4294967294, %s632_s16   ;;  %s632_s16 = sphi %s662_s16, %s19_s16   ;;  %s628_s15 = sphi %s660_s15, %s790_s15   ;;  %s624_s14 = sphi %s658_s14, %s789_s14   ;;  %s620_s13 = sphi %s656_s13, %s788_s13   ;;  %s616_s12 = sphi %s654_s12, %s787_s12   ;;  %s612_s11 = sphi %s652_s11, %s786_s11  }
   0x9   : > { %s31_s18 = sadd.s32 1, %s628_s15  ;;  %s59_s19 = sadd.s32 1, %s620_s13 }
   0xa   : > { %p33_p0 = scmp.ge.s32.totalorder %s31_s18, 2  ;;  %p66_p1 = scmp.ne.s32.totalorder %s620_s13, %s616_s12 }
   0xb   : > { %p67_p2 = scmp.eq.s32.totalorder %s632_s16, 0  ;;  %p72_p3 = scmp.ne.s32.totalorder %s616_s12, %s612_s11 }
   0xc   : > { %s792_s18 = smov (%p33_p0, %s31_s18), 0  ;;  %p73_p5 = scmp.eq.s32.totalorder %s433_s0, 0 }
   0xd   : > { %p693_p4 = por %p67_p2, %p66_p1  ;;  %s56_s21 = ssub.s32 %s628_s15, %s792_s18 }
   0xe   : > { %p98_p6 = scmp.eq.s32.totalorder %s433_s0, 1  ;;  %p57_p7 = scmp.eq.s32.totalorder %s56_s21, 0 }
   0xf   : > { %p699_p8 = por %p73_p5, %p72_p3  ;;  %p104_p10 = scmp.eq.s32.totalorder %s434_s17, 1 }
  0x10   : > { %p703_p9 = por %p98_p6, %p66_p1  ;;  %p436_p12 = scmp.ge.s32.totalorder %s632_s16, 2 }
  0x11   : > { %s708_s24 = scalar_select %p57_p7, %s620_s13, %s59_s19  }
  0x12   : > { %p710_p11 = por %p104_p10, %p72_p3  ;;  %p466_p13 = scmp.lt.s32.totalorder %s632_s16, 2 }
  0x13   : > { %s127_s26 = sand.u32 1, %s620_s13   ;;  %s452_s28 = sshll.u32 %s628_s15, 3 }
  0x14   : > { %s437_s27 = sshll.u32 %s127_s26, 3  ;;  %s136_s3 = scalar_lea.hbm %s780_s1, %s452_s28 }
  0x15   : > { %s131_s4 = scalar_lea.vmem [#allocation3], %s437_s27  ;;  %s138_s6 = sshll.u32 %s136_s3, 4  ;;  %s139_s6 = int_to_ptr.hbm [resolvable:$true] %s138_s6 }
  0x16   : > { %s140_s5 = sshll.u32 %s131_s4, 4  ;;  %p459_p0 = pnand %p466_p13, %p693_p4  ;;  %s141_s5 = int_to_ptr.vmem [resolvable:$true] %s140_s5 }
  0x17   : > { %p440_p1 = scmp.ge.s32.totalorder %s632_s16, 1  ;;  %p145_p2 = scmp.lt.s32.totalorder %s632_s16, 3 }
  0x18   : > { %s128_s7 = scalar_lea.sflag [#allocation4], %s127_s26 }
  0x19   : > { %461 = dma.hbm_to_vmem [thread:$0]  (!%p459_p0), %s139_s6, 128, %s141_s5, %s128_s7  }
  0x1a   : > { %p146_p3 = pnand %p440_p1, %p145_p2 }
  0x1b   : > { %s726_s8 = sand.u32 (!%p146_p3), 1, %s616_s12  }
  0x1c   : > { %149 = sbr.rel (%p146_p3) target bundleno = 588 (0x24c), region = 28  ;;  %s441_s9 = sshll.u32 (!%p146_p3), %s726_s8, 3 }
  0x1d   : > { %s152_s10 = scalar_lea.sflag (!%p146_p3), [#allocation4], %s726_s8  ;;  %s155_s0 = scalar_lea.vmem (!%p146_p3), [#allocation3], %s441_s9 }
  0x21   : > { %603 = dma.done.wait (%p699_p8), %s152_s10, 128  }
  0x22   : > { %605 = vsyncadd (%p699_p8), %s152_s10, 4294967168  ;;  %v178_v0 = vld [vmem:[%s155_s0] sm:$0xff]  ;;  %vm237_vm0 = vcmask 27648   ;;  %vm269_vm1 = vcmask 1043456   ;;  %vm265_vm6 = vcmask 31744   ;;  %s314_s17 = sld [smem:[#allocation2]] }
  0x23   : > { %186 = vst [vmem:[#allocation1] ss:$2 sm:$0xff] %v178_v0  ;;  %s453_s19 = sshll.u32 %s624_s14, 3  ;;  %s176_s26 = scalar_lea.vmem [#allocation6], %s441_s9 }
  0x24   : > { %s345_s22 = scalar_lea.hbm %s781_s2, %s453_s19  ;;  %s347_s27 = sshll.u32 %s176_s26, 4  ;;  %s348_s27 = int_to_ptr.vmem [resolvable:$true] %s347_s27 }
  0x25   : > { %s349_s28 = sshll.u32 %s345_s22, 4  ;;  %s332_s14 = scalar_lea.sflag [#allocation5], %s726_s8  ;;  %s350_s28 = int_to_ptr.hbm [resolvable:$true] %s349_s28 }
  0x26   : > { %s564_s29 = sshra.s32 %s350_s28, 4  ;;  %s570_s5 = scalar_lea.hbm %s781_s2, 16  ;;  %s565_s29 = int_to_ptr.hbm [resolvable:$true] %s564_s29 }
  0x27   : > { %s566_s30 = scalar_lea.hbm %s565_s29, 8  ;;  %p571_p7 = scmp.lt.s32.totalorder %s565_s29, %s781_s2 }
  0x28   : > { %v315_v28 = vstv %s314_s17  ;;  %p567_p4 = scmp.ne.s32.totalorder %s565_s29, %s566_s30  ;;  %p572_p8 = scmp.lt.s32.totalorder %s570_s5, %s566_s30 }
  0x2a   : > { %v187_v1 = vld.sshfl [vmem:[#allocation1] sm:$0xff pattern:$0x75316420]  ;;  %v188_v2 = vld.sshfl [vmem:[#allocation1 + $0x8] sm:$0xff pattern:$0x75316420]  ;;  %p568_p5 = pnand %p567_p4, %p703_p9  ;;  %p573_p10 = por %p572_p8, %p571_p7 }
  0x2b   : > { %192 = vst [vmem:[#allocation1] ss:$2 sm:$0xff] %v178_v0 }
  0x2c   : > { %p569_p6 = pneg %p568_p5 }
  0x2e   : > { %p574_p13 = pnand %p573_p10, %p569_p6 }
  0x32   : > { %v193_v3 = vld.sshfl [vmem:[#allocation1] sm:$0xff pattern:$0x75316420]  ;;  %v194_v4 = vld.sshfl [vmem:[#allocation1 + $0x8] sm:$0xff pattern:$0x75316420] }
  0x33   : > { %212 = vmatpush.xpose.msra.mxu0 %v193_v3  ;;  %232 = vmatpush.xpose.msra.mxu1 %v194_v4  ;;  %262 = vst [vmem:[#allocation1] ss:$2 sm:$0xff] %v178_v0 }
  0x36   : > { %213 = vmatmul.f32.vlgmr.msra.gmra.mxu0 %v187_v1  ;;  %233 = vmatmul.f32.vlgmr.msra.gmra.mxu1 %v188_v2 }
  0x3a   : > { %v263_v14 = vld.sshfl [vmem:[#allocation1] sm:$0xff pattern:$0x75316420]  ;;  %v264_v15 = vld.sshfl [vmem:[#allocation1 + $0x8] sm:$0xff pattern:$0x75316420] }
  0x3b   : > { %443 = vmatpush.msk.msra.mxu2 %vm269_vm1, %v263_v14  ;;  %445 = vmatpush.msk.msra.mxu3 %vm269_vm1, %v264_v15  ;;  %318 = vst [vmem:[#allocation1] ss:$2 sm:$0xff] %v178_v0 }
  0x42   : > { %v320_v31 = vld.sshfl [vmem:[#allocation1 + $0x8] sm:$0xff pattern:$0x75316420]  ;;  %v319_v34 = vld.sshfl [vmem:[#allocation1] sm:$0xff pattern:$0x75316420] }
  0xb3   : > { %v214_v5 = vpop.f32.mrf.mxu0  ;;  %v234_v6 = vpop.f32.mrf.mxu1 }
  0xb4   : > { %v235_v7 = vadd.f32 %v234_v6, %v214_v5 }
  0xb6   : > { %v238_v8 = vsel %vm237_vm0, %v235_v7, inf }
  0xb7   : > { %239 = vmin.xlane.f32.xlu0 %v238_v8 }
 0x12a   : > { %v240_v9 = vpop.xlane.xlu0 %239 }
 0x12b   : > { %v241_v10 = vsub.f32 %v240_v9, %v235_v7 }
 0x12d   : > { %v242_v11 = vmul.f32 1.442695, %v241_v10 }
 0x12f   : > { %516 = vpow2.f32 %v242_v11 }
 0x135   : > { %v517_v12 = vpop.eup %516 }
 0x136   : > { %v244_v13 = vsel %vm237_vm0, %v517_v12, 0.0 }
 0x137   : > { %245 = vadd.xlane.f32.xlu0 %v244_v13 }
 0x1aa   : > { %v246_v16 = vpop.xlane.xlu0 %245 }
 0x1ab   : > { %518 = vrcp.f32 %v246_v16  ;;  %v258_v20 = vand.u32 2147483648, %v246_v16  ;;  %v256_v22 = vand.u32 2147483647, %v246_v16  ;;  %vm252_vm3 = vweird.f32 %v246_v16 }
 0x1ad   : > { %v259_v24 = vor.u32 1.1754944e-38, %v258_v20  ;;  %vm257_vm5 = vcmp.eq.f32.partialorder %v256_v22, 8.507059e+37 }
 0x1b1   : > { %v519_v17 = vpop.eup %518 }
 0x1b2   : > { %v248_v18 = vmul.f32 %v519_v17, %v246_v16  ;;  %vm253_vm2 = vweird.f32 %v519_v17 }
 0x1b3   : > { %vm254_vm4 = vmor %vm252_vm3, %vm253_vm2 }
 0x1b4   : > { %v249_v19 = vsub.f32 1.0, %v248_v18 }
 0x1b6   : > { %v250_v21 = vmul.f32 %v519_v17, %v249_v19 }
 0x1b8   : > { %v251_v23 = vadd.f32 %v519_v17, %v250_v21 }
 0x1ba   : > { %v255_v25 = vsel %vm254_vm4, %v519_v17, %v251_v23 }
 0x1bb   : > { %v260_v26 = vsel %vm257_vm5, %v259_v24, %v255_v25 }
 0x1bc   : > { %v261_v27 = vmul.f32 %v517_v12, %v260_v26 }
 0x1be   : > { %444 = vmatmul.msk.f32.vlgmr.msra.gmra.mxu2 %vm265_vm6, %v261_v27  ;;  %446 = vmatmul.msk.f32.vlgmr.msra.gmra.mxu3 %vm265_vm6, %v261_v27 }
 0x241   : > { %v291_v29 = vpop.f32.mrf.mxu2  ;;  %v311_v30 = vpop.f32.mrf.mxu3 }
 0x242   : > { %v316_v32 = vmul.f32 %v315_v28, %v291_v29  ;;  %v317_v33 = vmul.f32 %v315_v28, %v311_v30 }
 0x244   : > { %v324_v35 = vadd.f32 %v320_v31, %v317_v33  ;;  %v323_v36 = vadd.f32 %v319_v34, %v316_v32 }
 0x246   : > { %v327_v37 = vrot.slane %v324_v35, 4 }
 0x248   : > { %v328_v38 = vsel %vm269_vm1, %v323_v36, %v327_v37 }
 0x249   : > { %330 = vst [vmem:[%s176_s26] sm:$0xff] %v328_v38 }
 0x24a   : > { %577 = shalt.err (!%p574_p13)
}
 0x24b   : > { %456 = dma.vmem_to_hbm [thread:$0]  (%p703_p9), %s348_s27, 128, %s350_s28, %s332_s14  }
 0x24c PF: > { %s361_s8 = sand.u32 1, %s612_s11   ;;  %p463_p0 = pnand %p436_p12, %p710_p11 }
 0x24d   : > { %s362_s9 = scalar_lea.sflag [#allocation5], %s361_s8 }
 0x24e   : > { %p464_p1 = pneg %p463_p0 }
 0x250   : > { %607 = dma.done.wait (%p464_p1), %s362_s9, 128  }
 0x251   : > { %609 = vsyncadd (%p464_p1), %s362_s9, 4294967168  ;;  %s19_s16 = sadd.s32 1, %s632_s16   ;;  %s786_s11 = smov %s616_s12 }
 0x252   : > { %p16_p2 = scmp.ge.s32.totalorder %s19_s16, 4   ;;  %s787_s12 = smov %s620_s13 }
 0x253   : > { %s788_s13 = smov %s708_s24  ;;  %s789_s14 = smov %s628_s15 }
 0x254   : > { %s790_s15 = smov %s792_s18  ;;  %18 = sbr.rel (!%p16_p2) target bundleno = 8 (0x8), region = 74 }
 0x259   :  { %368 = vsyncpa [#allocation4], 1 }
 0x25a   :  { %370 = vsyncpa [#allocation4 + $0x1], 1 }
 0x25b   :  { %371 = vsyncpa [#allocation5], 1 }
 0x25c   :  { %373 = vsyncpa [#allocation5 + $0x1], 1 }

</bundles_post_ra>
